<compile_context>
chip_gen: v7x
topology: tpu7x:2x2x1
jax: 0.10.0
libtpu: 0.0.40
codegen_flags: <defaults>
</compile_context>

<pallas_src>
import functools
import math

import jax
import jax.numpy as jnp
from jax.experimental import pallas as pl
from jax.experimental.pallas import tpu as pltpu


def _round_up(x, m):
    return (x + m - 1) // m * m


def _cb_kernel(x_ref, w_ref, shift_ref, o_ref, acc_ref):
    # x_ref:     (1, 1, TK, TL)   im2col patch tile (lane axis = output pixels)
    # w_ref:     (1, TC, TK)      BN-scale-folded conv weights for this group/ctile/ktile
    # shift_ref: (1, TC, 1)       BN shift (beta - mean * scale)
    # o_ref:     (1, 1, TC, TL)
    # acc_ref:   (TC, TL) f32 scratch accumulator
    k = pl.program_id(4)

    @pl.when(k == 0)
    def _init():
        acc_ref[...] = jnp.zeros_like(acc_ref)

    acc_ref[...] += jnp.dot(
        w_ref[0], x_ref[0, 0],
        preferred_element_type=jnp.float32,
        precision=jax.lax.Precision.HIGHEST,
    )

    @pl.when(k == pl.num_programs(4) - 1)
    def _finalize():
        o_ref[0, 0] = (acc_ref[...] + shift_ref[0]).astype(o_ref.dtype)


@functools.partial(jax.jit,
                   static_argnames=("k_size", "stride", "dilation", "groups"))
def cb_forward(x, weight, gamma, beta, running_mean, running_var,
               *, k_size, stride=1, dilation=1, groups=1, eps=1e-5):
    """CB forward: Conv2d(bias=False, conv dilation=1) + BatchNorm2d (eval mode).

    x:      (N, Cin, H, W) float32 (NCHW, PyTorch layout)
    weight: (Cout, Cin // groups, k, k) float32
    gamma, beta, running_mean, running_var: (Cout,) float32
    """
    N, Cin, H, W = x.shape
    Cout = weight.shape[0]
    K = k_size
    Cin_g = Cin // groups
    Cout_g = Cout // groups

    # Matches the PyTorch module: padding uses `dilation`, the conv itself uses dilation=1.
    pad = ((K - 1) // 2) * dilation
    Ho = (H + 2 * pad - K) // stride + 1
    Wo = (W + 2 * pad - K) // stride + 1
    HoWo = Ho * Wo
    Kg = Cin_g * K * K

    # ---- tiling decisions (all static) -------------------------------------
    MAX_TK = 1024          # contraction tile
    MAX_TC = 256           # output-channel tile

    Kg8 = _round_up(Kg, 8)
    if Kg8 <= MAX_TK:
        TK, Kp, Kt = Kg8, Kg8, 1
    else:
        Kt = math.ceil(Kg / MAX_TK)
        TK = _round_up(math.ceil(Kg / Kt), 128)   # lane-aligned (w's last dim)
        Kp = TK * Kt

    Cg8 = _round_up(Cout_g, 8)
    if Cg8 <= MAX_TC:
        TC, Cp, Ct = Cg8, Cg8, 1
    else:
        Ct = math.ceil(Cout_g / MAX_TC)
        TC = _round_up(math.ceil(Cout_g / Ct), 8)
        Cp = TC * Ct

    # Lane tile: lane-dense (multiple of 128); keep x block <= ~6 MiB and the
    # output/accumulator blocks <= ~3 MiB so double-buffering fits comfortably.
    max_tl_x = (6 * 1024 * 1024) // (4 * TK)
    max_tl_o = (3 * 1024 * 1024) // (4 * TC)
    max_tl = max(128, min(max_tl_x, max_tl_o) // 128 * 128)
    TL = min(_round_up(HoWo, 128), max_tl)
    Lp = _round_up(HoWo, TL)

    # ---- wrapper glue (plain JAX): fold BN into conv, build im2col patches ----
    inv_std = jax.lax.rsqrt(running_var + eps)
    scale = gamma * inv_std                      # (Cout,)
    shift = beta - running_mean * scale          # (Cout,)

    wmat = weight.reshape(Cout, Kg) * scale[:, None]
    wmat = wmat.reshape(groups, Cout_g, Kg)
    wmat = jnp.pad(wmat, ((0, 0), (0, Cp - Cout_g), (0, Kp - Kg)))
    shift_g = shift.reshape(groups, Cout_g, 1)
    shift_g = jnp.pad(shift_g, ((0, 0), (0, Cp - Cout_g), (0, 0)))

    xpad = jnp.pad(x, ((0, 0), (0, 0), (pad, pad), (pad, pad)))
    slabs = []
    for kh in range(K):
        for kw in range(K):
            slabs.append(
                xpad[:, :,
                     kh: kh + (Ho - 1) * stride + 1: stride,
                     kw: kw + (Wo - 1) * stride + 1: stride])
    # (N, Cin, K*K, Ho, Wo) -> (N, groups, Cin_g*K*K, Ho*Wo)   (NCHW-native ordering)
    patches = jnp.stack(slabs, axis=2).reshape(N, groups, Kg, HoWo)
    patches = jnp.pad(patches, ((0, 0), (0, 0), (0, Kp - Kg), (0, Lp - HoWo)))

    out = pl.pallas_call(
        _cb_kernel,
        out_shape=jax.ShapeDtypeStruct((N, groups, Cp, Lp), x.dtype),
        grid_spec=pltpu.PrefetchScalarGridSpec(
            num_scalar_prefetch=0,
            grid=(N, groups, Ct, Lp // TL, Kt),
            in_specs=[
                pl.BlockSpec((1, 1, TK, TL), lambda n, g, c, l, k: (n, g, k, l)),
                pl.BlockSpec((1, TC, TK), lambda n, g, c, l, k: (g, c, k)),
                pl.BlockSpec((1, TC, 1), lambda n, g, c, l, k: (g, c, 0)),
            ],
            out_specs=pl.BlockSpec((1, 1, TC, TL),
                                   lambda n, g, c, l, k: (n, g, c, l)),
            scratch_shapes=[pltpu.VMEM((TC, TL), jnp.float32)],
        ),
        compiler_params=pltpu.CompilerParams(
            dimension_semantics=("parallel", "parallel", "parallel",
                                 "parallel", "arbitrary"),
            vmem_limit_bytes=48 * 1024 * 1024),
    )(patches, wmat, shift_g)

    # Clip channel/lane padding -> NCHW directly (no transpose).
    return out[:, :, :Cout_g, :HoWo].reshape(N, Cout, Ho, Wo)


def _reference(x, weight, gamma, beta, running_mean, running_var,
               *, k_size, stride, dilation, groups, eps=1e-5):
    # Pure-JAX reference of the PyTorch CB module (eval-mode BN).
    pad = ((k_size - 1) // 2) * dilation
    y = jax.lax.conv_general_dilated(
        x, weight,
        window_strides=(stride, stride),
        padding=((pad, pad), (pad, pad)),
        dimension_numbers=("NCHW", "OIHW", "NCHW"),
        feature_group_count=groups,
        precision=jax.lax.Precision.HIGHEST)
    g = gamma[None, :, None, None]
    b = beta[None, :, None, None]
    m = running_mean[None, :, None, None]
    v = running_var[None, :, None, None]
    return (y - m) * jax.lax.rsqrt(v + eps) * g + b


if __name__ == "__main__":
    key = jax.random.PRNGKey(0)
    kx, kw, kg, kb, km, kv = jax.random.split(key, 6)

    N, nIn, nOut, H, W = 2, 4, 8, 16, 16
    kSize, stride, dilation, groups = 3, 1, 1, 1

    x = jax.random.normal(kx, (N, nIn, H, W), dtype=jnp.float32)
    fan_in = (nIn // groups) * kSize * kSize
    weight = jax.random.normal(
        kw, (nOut, nIn // groups, kSize, kSize), dtype=jnp.float32) / math.sqrt(fan_in)
    gamma = 1.0 + 0.1 * jax.random.normal(kg, (nOut,), dtype=jnp.float32)
    beta = 0.1 * jax.random.normal(kb, (nOut,), dtype=jnp.float32)
    running_mean = 0.1 * jax.random.normal(km, (nOut,), dtype=jnp.float32)
    running_var = 1.0 + 0.1 * jax.random.uniform(kv, (nOut,), dtype=jnp.float32)

    out = cb_forward(x, weight, gamma, beta, running_mean, running_var,
                     k_size=kSize, stride=stride, dilation=dilation, groups=groups)
    out = jax.block_until_ready(out)

    ref = _reference(x, weight, gamma, beta, running_mean, running_var,
                     k_size=kSize, stride=stride, dilation=dilation, groups=groups)
    assert out.shape == (N, nOut, H, W)
    assert jnp.allclose(out, ref, atol=1e-4, rtol=1e-4), float(jnp.max(jnp.abs(out - ref)))

    print("KERNEL_OK")
</pallas_src>

<mosaic_0001>
module attributes {stable_mosaic.version = 11 : i64} {
  func.func @_cb_kernel(%arg0: i32, %arg1: i32, %arg2: i32, %arg3: i32, %arg4: i32, %arg5: memref<1x1x40x256xf32, #tpu.memory_space<vmem>>, %arg6: memref<1x8x40xf32, #tpu.memory_space<vmem>>, %arg7: memref<1x8x1xf32, #tpu.memory_space<vmem>>, %arg8: memref<1x1x8x256xf32, #tpu.memory_space<vmem>>, %arg9: memref<8x256xf32, #tpu.memory_space<vmem>>) attributes {dimension_semantics = [#tpu.dimension_semantics<parallel>, #tpu.dimension_semantics<parallel>, #tpu.dimension_semantics<parallel>, #tpu.dimension_semantics<parallel>, #tpu.dimension_semantics<arbitrary>], iteration_bounds = array<i64: 2, 1, 1, 1, 1>, scalar_prefetch = 0 : i64, scratch_operands = 1 : i64, tpu.core_type = #tpu.core_type<tc>, window_params = [{transform_indices = @transform_0, window_bounds = array<i64: 1, 1, 40, 256>}, {transform_indices = @transform_1, window_bounds = array<i64: 1, 8, 40>}, {transform_indices = @transform_2, window_bounds = array<i64: 1, 8, 1>}, {transform_indices = @transform_3, window_bounds = array<i64: 1, 1, 8, 256>}]} {
    %c0_i32 = arith.constant 0 : i32
    %0 = arith.cmpi eq, %arg4, %c0_i32 : i32
    %1 = arith.extui %0 : i1 to i32
    %c0_i32_0 = arith.constant 0 : i32
    %2 = arith.cmpi ne, %1, %c0_i32_0 : i32
    scf.if %2 {
      %cst_13 = arith.constant 0.000000e+00 : f32
      %14 = vector.broadcast %cst_13 : f32 to vector<8x256xf32>
      %c0_14 = arith.constant 0 : index
      %c0_15 = arith.constant 0 : index
      %15 = vector.load %arg9[%c0_14, %c0_15] : memref<8x256xf32, #tpu.memory_space<vmem>>, vector<8x256xf32>
      tpu.vector_store %arg9[%c0_14, %c0_15], %14 {strides = array<i32>} : memref<8x256xf32, #tpu.memory_space<vmem>>, vector<8x256xf32>,
    } else {
    }
    %c0 = arith.constant 0 : index
    %c0_1 = arith.constant 0 : index
    %3 = vector.load %arg9[%c0, %c0_1] : memref<8x256xf32, #tpu.memory_space<vmem>>, vector<8x256xf32>
    %c0_2 = arith.constant 0 : index
    %c0_3 = arith.constant 0 : index
    %c0_4 = arith.constant 0 : index
    %4 = vector.load %arg6[%c0_2, %c0_3, %c0_4] : memref<1x8x40xf32, #tpu.memory_space<vmem>>, vector<1x8x40xf32>
    %5 = vector.shape_cast %4 : vector<1x8x40xf32> to vector<8x40xf32>
    %c0_5 = arith.constant 0 : index
    %c0_6 = arith.constant 0 : index
    %c0_7 = arith.constant 0 : index
    %c0_8 = arith.constant 0 : index
    %6 = vector.load %arg5[%c0_5, %c0_6, %c0_7, %c0_8] : memref<1x1x40x256xf32, #tpu.memory_space<vmem>>, vector<1x1x40x256xf32>
    %7 = vector.shape_cast %6 : vector<1x1x40x256xf32> to vector<40x256xf32>
    %cst = arith.constant dense<0.000000e+00> : vector<8x256xf32>
    %8 = tpu.matmul %5, %7, %cst {dimension_numbers = #tpu.dot_dimension_numbers<[1], [0], [0], [1], [0, 0, 1, 1], [], []>, precision = #tpu.contract_precision<fp32>} : vector<8x40xf32>, vector<40x256xf32>, vector<8x256xf32> -> vector<8x256xf32>
    %9 = arith.addf %3, %8 : vector<8x256xf32>
    %c0_9 = arith.constant 0 : index
    %c0_10 = arith.constant 0 : index
    %10 = vector.load %arg9[%c0_9, %c0_10] : memref<8x256xf32, #tpu.memory_space<vmem>>, vector<8x256xf32>
    tpu.vector_store %arg9[%c0_9, %c0_10], %9 {strides = array<i32>} : memref<8x256xf32, #tpu.memory_space<vmem>>, vector<8x256xf32>,
    %c0_i32_11 = arith.constant 0 : i32
    %11 = arith.cmpi eq, %arg4, %c0_i32_11 : i32
    %12 = arith.extui %11 : i1 to i32
    %c0_i32_12 = arith.constant 0 : i32
    %13 = arith.cmpi ne, %12, %c0_i32_12 : i32
    scf.if %13 {
      %c0_13 = arith.constant 0 : index
      %c0_14 = arith.constant 0 : index
      %14 = vector.load %arg9[%c0_13, %c0_14] : memref<8x256xf32, #tpu.memory_space<vmem>>, vector<8x256xf32>
      %c0_15 = arith.constant 0 : index
      %c0_16 = arith.constant 0 : index
      %c0_17 = arith.constant 0 : index
      %15 = vector.load %arg7[%c0_15, %c0_16, %c0_17] : memref<1x8x1xf32, #tpu.memory_space<vmem>>, vector<1x8x1xf32>
      %16 = vector.shape_cast %15 : vector<1x8x1xf32> to vector<8x1xf32>
      %17 = vector.broadcast %16 : vector<8x1xf32> to vector<8x256xf32>
      %18 = arith.addf %14, %17 : vector<8x256xf32>
      %c0_18 = arith.constant 0 : index
      %c0_19 = arith.constant 0 : index
      %c0_20 = arith.constant 0 : index
      %c0_21 = arith.constant 0 : index
      %19 = vector.load %arg8[%c0_18, %c0_19, %c0_20, %c0_21] : memref<1x1x8x256xf32, #tpu.memory_space<vmem>>, vector<1x1x8x256xf32>
      %20 = vector.shape_cast %19 : vector<1x1x8x256xf32> to vector<8x256xf32>
      %21 = vector.shape_cast %18 : vector<8x256xf32> to vector<1x1x8x256xf32>
      tpu.vector_store %arg8[%c0_18, %c0_19, %c0_20, %c0_21], %21 {strides = array<i32>} : memref<1x1x8x256xf32, #tpu.memory_space<vmem>>, vector<1x1x8x256xf32>,
    } else {
    }
    return
  }
  func.func @transform_0(%arg0: i32, %arg1: i32, %arg2: i32, %arg3: i32, %arg4: i32) -> (i32, i32, i32, i32) {
    %c0_i32 = arith.constant 0 : i32
    return %arg0, %arg1, %arg4, %arg3 : i32, i32, i32, i32
  }
  func.func @transform_1(%arg0: i32, %arg1: i32, %arg2: i32, %arg3: i32, %arg4: i32) -> (i32, i32, i32) {
    %c0_i32 = arith.constant 0 : i32
    return %arg1, %arg2, %arg4 : i32, i32, i32
  }
  func.func @transform_2(%arg0: i32, %arg1: i32, %arg2: i32, %arg3: i32, %arg4: i32) -> (i32, i32, i32) {
    %c0_i32 = arith.constant 0 : i32
    %c0_i32_0 = arith.constant 0 : i32
    return %arg1, %arg2, %c0_i32 : i32, i32, i32
  }
  func.func @transform_3(%arg0: i32, %arg1: i32, %arg2: i32, %arg3: i32, %arg4: i32) -> (i32, i32, i32, i32) {
    %c0_i32 = arith.constant 0 : i32
    return %arg0, %arg1, %arg2, %arg3 : i32, i32, i32, i32
  }
}

</mosaic_0001>

<bundles_post_ra>
// kernel: cb_forward.1
= control target key start
LH: loop header
LB: loop body
LE: loop exit
PB: predicated region body
PF: predicated region fallthrough
CT: control target
= control target key end

     0   :  { %s1286_s12 = smov 0   ;;  %s1288_s13 = smov 0   ;;  %s1427_s0 = inlined_call_operand.vmem [shape: f32[2,1,40,256], index: 0, kind: input, shape index: {}]   ;;  %s1428_s1 = inlined_call_operand.vmem [shape: f32[1,8,40], index: 1, kind: input, shape index: {}]   ;;  %s1429_s2 = inlined_call_operand.vmem [shape: f32[1,8,1], index: 2, kind: input, shape index: {}]   ;;  %s1430_s3 = inlined_call_operand.vmem [shape: f32[2,1,8,256], index: 3, kind: output, shape index: {}]  }
   0x1   :  { %s1290_s14 = smov 0  }
   0x2 LB: > { %s46_s15 = sadd.s32 1, %s1258_s13  ;;  %p1147_p0 = scmp.ge.s32.totalorder %s1262_s14, 1  ;;  %s1262_s14 = sphi %s1290_s14, %s13_s14   ;;  %s1258_s13 = sphi %s1288_s13, %s1432_s13   ;;  %s1254_s12 = sphi %s1286_s12, %s1431_s12  }
   0x3   : > { %p48_p1 = scmp.ge.s32.totalorder %s46_s15, 2  ;;  %p230_p2 = scmp.lt.s32.totalorder %s1262_s14, 3 }
   0x5   : > { %s1434_s15 = smov (%p48_p1, %s46_s15), 0  ;;  %p231_p3 = pnand %p1147_p0, %p230_p2 }
   0x6   : > { %p298_p4 = scmp.lt.s32.totalorder (!%p231_p3), %s1254_s12, 1  ;;  %v359_v0 = vld [vmem:[%s1428_s1] sm:$0xff] (!%p231_p3)  ;;  %vm370_vm0 = vcmask (!%p231_p3), 326656   ;;  %v1264_v2 = vmov (!%p231_p3), 0.0   ;;  %v1265_v5 = vmov (!%p231_p3), 0  }
   0x7   : > { %234 = sbr.rel (%p231_p3) target bundleno = 273 (0x111), region = 32  ;;  %v952_v1 = vld [vmem:[%s1429_s2] sm:$0xff] (!%p231_p3)  ;;  %448 = vmatprep.mubr.f32.mxu1 (!%p231_p3), %v1264_v2  ;;  %749 = vmatprep.mubr.f32.mxu0 (!%p231_p3), %v1264_v2  ;;  %v372_v3 = vsel (!%p231_p3), %vm370_vm0, %v359_v0, 0 }
   0x8   : > { %v1314_v4 = vand.u32 (!%p231_p3), 4294901760, %v372_v3  ;;  %1239 = vset.pattern.permute.xlu0 (!%p231_p3), %v1265_v5 }
   0x9   : > { %955 = vperm.xlu0 (!%p231_p3), %1239, %v952_v1  }
   0xa   : > { %v1318_v6 = vsub.f32 (!%p231_p3), %v372_v3, %v1314_v4 }
   0xc   : > { %v451_v10 = vand.u32 (!%p231_p3), 4294901760, %v1318_v6 }
   0xe   : > { %s1436_s12 = smov (!%p298_p4, %s1254_s12), 1  ;;  %v452_v31 = vsub.f32 %v1318_v6, %v451_v10 }
   0xf   : > { %s1212_s20 = smul.u32 80, %s1436_s12  ;;  %s1153_s24 = sshll.u32 %s1436_s12, 4 }
  0x10   : > { %v453_v47 = vand.u32 4294901760, %v452_v31  ;;  %s349_s27 = scalar_lea.vmem %s1430_s3, %s1153_s24 }
  0x11   : > { %s313_s23 = scalar_lea.vmem %s1427_s0, %s1212_s20 }
  0x12   : > { %v361_v7 = vld [vmem:[%s313_s23 + $0x8] sm:$0xff]  ;;  %v363_v8 = vld [vmem:[%s313_s23 + $0x18] sm:$0xff]  ;;  %v360_v9 = vld [vmem:[%s313_s23] sm:$0xff] }
  0x13   : > { %v374_v11 = vand.u32 4294901760, %v361_v7  ;;  %v378_v12 = vand.u32 4294901760, %v363_v8  ;;  %v362_v13 = vld [vmem:[%s313_s23 + $0x10] sm:$0xff]  ;;  %v376_v14 = vand.u32 4294901760, %v360_v9  ;;  %v365_v15 = vld [vmem:[%s313_s23 + $0x28] sm:$0xff]  ;;  %v367_v16 = vld [vmem:[%s313_s23 + $0x38] sm:$0xff] }
  0x14   : > { %v380_v17 = vand.u32 4294901760, %v362_v13  ;;  %v382_v18 = vand.u32 4294901760, %v365_v15  ;;  %v386_v19 = vand.u32 4294901760, %v367_v16  ;;  %v364_v20 = vld [vmem:[%s313_s23 + $0x20] sm:$0xff]  ;;  %v366_v21 = vld [vmem:[%s313_s23 + $0x30] sm:$0xff]  ;;  %v369_v26 = vld [vmem:[%s313_s23 + $0x48] sm:$0xff] }
  0x15   : > { %v1324_v22 = vpack.c.bf16 %v378_v12, %v374_v11  ;;  %v1326_v23 = vsub.f32 %v361_v7, %v374_v11  ;;  %v1328_v24 = vsub.f32 %v363_v8, %v378_v12  ;;  %v1330_v25 = vsub.f32 %v360_v9, %v376_v14  ;;  %v368_v27 = vld [vmem:[%s313_s23 + $0x40] sm:$0xff] }
  0x16   : > { %v1332_v28 = vpack.c.bf16 %v380_v17, %v376_v14  ;;  %v1334_v29 = vsub.f32 %v362_v13, %v380_v17  ;;  %v1336_v30 = vpack.c.bf16 %v386_v19, %v382_v18  ;;  %v1343_v32 = vsub.f32 %v365_v15, %v382_v18 }
  0x17   : > { %1155 = vmatprep.subr.bf16.mxu1 %v1324_v22  ;;  %1179 = vmatprep.subr.bf16.mxu0 %v1324_v22  ;;  %v1345_v33 = vsub.f32 %v367_v16, %v386_v19  ;;  %v384_v34 = vand.u32 4294901760, %v364_v20  ;;  %v388_v35 = vand.u32 4294901760, %v366_v21  ;;  %v1349_v36 = vand.u32 4294901760, %v369_v26 }
  0x18   : > { %1157 = vmatpush1.bf16.msra.mxu1 %v1332_v28  ;;  %1181 = vmatpush1.bf16.msra.mxu0 %v1332_v28  ;;  %v1351_v37 = vand.u32 4294901760, %v368_v27  ;;  %v462_v38 = vand.u32 4294901760, %v1326_v23  ;;  %v474_v39 = vand.u32 4294901760, %v1328_v24  ;;  %v468_v43 = vand.u32 4294901760, %v1330_v25 }
  0x19   : > { %1159 = vmatprep.subr.bf16.mxu1 %v1336_v30  ;;  %1183 = vmatprep.subr.bf16.mxu0 %v1336_v30  ;;  %v1357_v40 = vpack.c.bf16 %v388_v35, %v384_v34  ;;  %v1359_v41 = vsub.f32 %v364_v20, %v384_v34  ;;  %v1361_v42 = vsub.f32 %v366_v21, %v388_v35  ;;  %v480_v49 = vand.u32 4294901760, %v1334_v29 }
  0x1a   : > { %v1365_v44 = vsub.f32 %v368_v27, %v1351_v37  ;;  %v463_v45 = vsub.f32 %v1326_v23, %v462_v38  ;;  %v475_v46 = vsub.f32 %v1328_v24, %v474_v39  ;;  %v469_v48 = vsub.f32 %v1330_v25, %v468_v43 }
  0x1b   : > { %v486_v50 = vand.u32 4294901760, %v1343_v32  ;;  %v498_v51 = vand.u32 4294901760, %v1345_v33  ;;  %v492_v54 = vand.u32 4294901760, %v1359_v41  ;;  %v504_v55 = vand.u32 4294901760, %v1361_v42 }
  0x1c   : > { %1161 = vmatpush1.bf16.msra.mxu1 %v1357_v40  ;;  %1185 = vmatpush1.bf16.msra.mxu0 %v1357_v40  ;;  %v464_v52 = vand.u32 4294901760, %v463_v45  ;;  %v476_v53 = vand.u32 4294901760, %v475_v46  ;;  %v1186_v56 = vpack.c.bf16 %v474_v39, %v462_v38  ;;  %v470_v57 = vand.u32 4294901760, %v469_v48 }
  0x1d   : > { %391 = vmatprep.subr.mxu1 %v1349_v36  ;;  %692 = vmatprep.subr.mxu0 %v1349_v36  ;;  %v481_v58 = vsub.f32 %v1334_v29, %v480_v49  ;;  %v487_v59 = vsub.f32 %v1343_v32, %v486_v50  ;;  %v1188_v61 = vpack.c.bf16 %v480_v49, %v468_v43  ;;  %v516_v11 = vand.u32 4294901760, %v1365_v44 }
  0x1e   : > { %v1162_v60 = vpack.c.bf16 %v476_v53, %v464_v52  ;;  %v499_v62 = vsub.f32 %v1345_v33, %v498_v51  ;;  %v493_v63 = vsub.f32 %v1359_v41, %v492_v54  ;;  %v1190_v3 = vpack.c.bf16 %v498_v51, %v486_v50 }
  0x1f   : > { %v482_v0 = vand.u32 4294901760, %v481_v58  ;;  %v488_v1 = vand.u32 4294901760, %v487_v59  ;;  %v505_v5 = vsub.f32 %v1361_v42, %v504_v55  ;;  %v509_v9 = vsub.f32 %v369_v26, %v1349_v36 }
  0x20   : > { %393 = vmatpush1.msra.mxu1 %v1351_v37  ;;  %694 = vmatpush1.msra.mxu0 %v1351_v37  ;;  %v500_v7 = vand.u32 4294901760, %v499_v62  ;;  %v494_v8 = vand.u32 4294901760, %v493_v63  ;;  %v1192_v17 = vpack.c.bf16 %v504_v55, %v492_v54  ;;  %v517_v18 = vsub.f32 %v1365_v44, %v516_v11 }
  0x21   : > { %1163 = vmatprep.subr.bf16.mxu1 %v1162_v60  ;;  %1187 = vmatprep.subr.bf16.mxu0 %v1186_v56  ;;  %v1164_v12 = vpack.c.bf16 %v482_v0, %v470_v57  ;;  %v506_v13 = vand.u32 4294901760, %v505_v5  ;;  %v510_v15 = vand.u32 4294901760, %v509_v9  ;;  %v1172_v26 = vpack.c.bf16 %v1334_v29, %v1330_v25 }
  0x22   : > { %454 = vmatmul.mubr.f32.vlgmr.msra.gmra.mrb[0].mxu1 %v453_v47  ;;  %753 = vmatmul.mubr.f32.vlgmr.msra.gmra.mrb[0].mxu0 %v451_v10  ;;  %v1166_v14 = vpack.c.bf16 %v500_v7, %v488_v1  ;;  %v518_v21 = vand.u32 4294901760, %v517_v18  ;;  %v1170_v10 = vpack.c.bf16 %v1328_v24, %v1326_v23  ;;  %v1174_v27 = vpack.c.bf16 %v1345_v33, %v1343_v32 }
  0x23   : > { %1165 = vmatpush1.bf16.msra.mxu1 %v1164_v12  ;;  %1189 = vmatpush1.bf16.msra.mxu0 %v1188_v61  ;;  %v1168_v16 = vpack.c.bf16 %v506_v13, %v494_v8  ;;  %v511_v19 = vsub.f32 %v509_v9, %v510_v15  ;;  %v1176_v23 = vpack.c.bf16 %v1361_v42, %v1359_v41 }
  0x24   : > { %1167 = vmatprep.subr.bf16.mxu1 %v1166_v14  ;;  %1191 = vmatprep.subr.bf16.mxu0 %v1190_v3 }
  0x25   : > { %574 = vmatprep.mubr.f32.mxu1 %v1264_v2  ;;  %853 = vmatprep.mubr.f32.mxu0 %v1264_v2  ;;  %v512_v20 = vand.u32 4294901760, %v511_v19 }
  0x27   : > { %1169 = vmatpush1.bf16.msra.mxu1 %v1168_v16  ;;  %1193 = vmatpush1.bf16.msra.mxu0 %v1192_v17 }
  0x28   : > { %513 = vmatprep.subr.mxu1 %v512_v20  ;;  %794 = vmatprep.subr.mxu0 %v510_v15 }
  0x2b   : > { %519 = vmatpush1.msra.mxu1 %v518_v21  ;;  %798 = vmatpush1.msra.mxu0 %v516_v11 }
  0x2c   : > { %1171 = vmatprep.subr.bf16.mxu1 %v1170_v10  ;;  %1195 = vmatprep.subr.bf16.mxu0 %v1324_v22 }
  0x2d   : > { %576 = vmatmul.mubr.f32.vlgmr.msra.gmra.mrb[0].mxu1 %v1314_v4  ;;  %855 = vmatmul.mubr.f32.vlgmr.msra.gmra.mrb[0].mxu0 %v1314_v4 }
  0x2e   : > { %1173 = vmatpush1.bf16.msra.mxu1 %v1172_v26  ;;  %1197 = vmatpush1.bf16.msra.mxu0 %v1332_v28 }
  0x2f   : > { %1175 = vmatprep.subr.bf16.mxu1 %v1174_v27  ;;  %1199 = vmatprep.subr.bf16.mxu0 %v1336_v30 }
  0x30   : > { %666 = vmatprep.mubr.f32.mxu1 %v1264_v2  ;;  %935 = vmatprep.mubr.f32.mxu0 %v1264_v2 }
  0x32   : > { %1177 = vmatpush1.bf16.msra.mxu1 %v1176_v23  ;;  %1201 = vmatpush1.bf16.msra.mxu0 %v1357_v40 }
  0x33   : > { %608 = vmatprep.subr.mxu1 %v509_v9  ;;  %878 = vmatprep.subr.mxu0 %v1349_v36 }
  0x36   : > { %611 = vmatpush1.msra.mxu1 %v1365_v44  ;;  %880 = vmatpush1.msra.mxu0 %v1351_v37 }
  0x37   : > { %669 = vmatmul.mubr.f32.vlgmr.msra.gmra.mrb[0].mxu1 %v1318_v6  ;;  %937 = vmatmul.mubr.f32.vlgmr.msra.gmra.mrb[0].mxu0 %v1314_v4 }
  0x88   : > { %v956_v22 = vpop.permute.xlu0 %955 }
 0x10a   : > { %v670_v24 = vpop.f32.mrb[0].mxu1  ;;  %v938_v25 = vpop.f32.mrb[0].mxu0 }
 0x10b   : > { %v1202_v28 = vadd.f32 %v938_v25, %v670_v24  ;;  %v672_v2 = vpop.f32.mrb[1].mxu1  ;;  %v940_v29 = vpop.f32.mrb[1].mxu0 }
 0x10c   : > { %v1203_v30 = vadd.f32 %v940_v29, %v672_v2 }
 0x10d   : > { %v958_v31 = vadd.f32 %v1202_v28, %v956_v22 }
 0x10e   : > { %v959_v32 = vadd.f32 %v1203_v30, %v956_v22 }
 0x10f   : > { %960 = vst [vmem:[%s349_s27] sm:$0xff] %v958_v31 }
 0x110   : > { %961 = vst [vmem:[%s349_s27 + $0x8] sm:$0xff] %v959_v32 }
 0x111 PF: > { %s13_s14 = sadd.s32 1, %s1262_s14   ;;  %s1431_s12 = smov %s1258_s13 }
 0x112   : > { %p10_p5 = scmp.ge.s32.totalorder %s13_s14, 4   ;;  %s1432_s13 = smov %s1434_s15 }
 0x114   :  { %12 = sbr.rel (!%p10_p5) target bundleno = 2 (0x2), region = 76 }

</bundles_post_ra>
